<compile_context>
chip_gen: v7x
topology: tpu7x:2x2x1
jax: 0.10.0
libtpu: 0.0.40
codegen_flags: <defaults>
</compile_context>

<pallas_src>
import jax
import jax.numpy as jnp
from jax.experimental import pallas as pl
from jax.experimental.pallas import tpu as pltpu

_LANE = 128
_SUBLANE = 8


def _round_up(x, m):
    return (x + m - 1) // m * m


def _choose_batch_tile(B, target=256, min_steps=2):
    """Batch rows per grid step.

    As large as `target` (sweep ~128..512 per generation / VMEM budget), always
    a multiple of 8, but halved until the grid keeps >= `min_steps` steps so
    the "parallel" axis shards across both v7x TensorCores and input/output
    DMA can double-buffer.  Tiny batches degrade gracefully to 8 rows.
    """
    bb = _round_up(min(target, _round_up(B, _SUBLANE)), _SUBLANE)
    while bb > _SUBLANE and _round_up(B, bb) // bb < min_steps:
        bb = _round_up(max(bb // 2, _SUBLANE), _SUBLANE)
    return bb


def attn_kernel(enc_ref, hid_ref, mask_ref, inp_ref,
                wae_ref, wah_ref, wv_ref, wci_ref, wca_ref,
                slab_ref):
    BB, H = hid_ref.shape
    T = mask_ref.shape[1]
    E = enc_ref.shape[1]

    enc_flat = enc_ref[...]                                        # (BB*T, E) bf16

    # active = tanh(attn([enc ; hid])) -- split into two MXU matmuls.
    proj_enc = jnp.dot(enc_flat, wae_ref[...],
                       preferred_element_type=jnp.float32)         # (BB*T, H) f32
    proj_hid = jnp.dot(hid_ref[...], wah_ref[...],
                       preferred_element_type=jnp.float32)         # (BB, H)   f32
    active = jnp.tanh(proj_enc.reshape(BB, T, H) + proj_hid[:, None, :])

    # attn_v(active).squeeze(2): VPU multiply + XLU lane reduce over H.
    scores = jnp.sum(active * wv_ref[...], axis=-1)                # (BB, T) f32

    # masked_fill_(1 - mask, -1e20), then softmax over T (f32 throughout).
    scores = jnp.where(mask_ref[...] > 0, scores, jnp.float32(-1e20))
    m = jnp.max(scores, axis=-1, keepdims=True)
    e = jnp.exp(scores - m)
    attn_w = e / jnp.sum(e, axis=-1, keepdims=True)                # exact: rows sum to 1

    # attn_applied = bmm(attn_w.unsqueeze(1), enc): VPU multiply + sublane
    # reduce over T (keeps the MXU vex slot for the projection matmuls and
    # avoids M=1 batched matmuls).  Cast-then-reshape keeps the f32 layout
    # split at the 8-sublane tile boundary.
    enc3 = enc_flat.astype(jnp.float32).reshape(BB, T, E)
    applied = jnp.sum(attn_w[:, :, None] * enc3, axis=1)           # (BB, E) f32

    # output = tanh(attn_combine([input ; applied])): two dots summed in f32,
    # no lane-axis concat.
    out = jnp.tanh(
        jnp.dot(inp_ref[...], wci_ref[...], preferred_element_type=jnp.float32)
        + jnp.dot(applied.astype(wca_ref.dtype), wca_ref[...],
                  preferred_element_type=jnp.float32))             # (BB, H) f32

    # Lane-dense slab: two direct sub-slice stores, unused lanes never read.
    slab_ref[:, 0:H] = out
    slab_ref[:, H:H + T] = attn_w


def prepare_attention_params(params, input_dim, hXdirs,
                             compute_dtype=jnp.bfloat16):
    """One-time weight prep (hoisted out of the per-step forward)."""
    attn_w = jnp.asarray(params["attn"], jnp.float32)              # (H, E + H)
    attn_v_w = jnp.asarray(params["attn_v"], jnp.float32)          # (1, H)
    comb_w = jnp.asarray(params["attn_combine"], jnp.float32)      # (H, D + E)
    E, D = hXdirs, input_dim
    return {
        "W_ae": attn_w[:, :E].T.astype(compute_dtype),             # (E, H)
        "W_ah": attn_w[:, E:].T.astype(compute_dtype),             # (H, H)
        "w_v": attn_v_w,                                           # (1, H) f32
        "W_comb_inp": comb_w[:, :D].T.astype(compute_dtype),       # (D, H)
        "W_comb_app": comb_w[:, D:].T.astype(compute_dtype),       # (E, H)
    }


def prepare_encoder_states(enc_states, attn_mask, *,
                           compute_dtype=jnp.bfloat16, batch_tile=256):
    """Once-per-sequence encoder prep (reused by every decode step).

    Casts to the MXU compute dtype, pads the batch to a multiple of the chosen
    batch tile (padded rows fully masked), and flattens to (B_pad*T, E) so the
    per-step HBM->VMEM DMA is contiguous and the kernel needs no retile.
    """
    B, T, E = enc_states.shape
    BB = _choose_batch_tile(B, batch_tile)
    B_pad = _round_up(B, BB)
    pad = B_pad - B
    enc = enc_states.astype(compute_dtype)
    mask = attn_mask.astype(jnp.int32)
    if pad:
        enc = jnp.pad(enc, ((0, pad), (0, 0), (0, 0)))
        mask = jnp.pad(mask, ((0, pad), (0, 0)))    # padded rows -> fully masked
    return {
        "enc_flat": enc.reshape(B_pad * T, E),
        "mask": mask,
        "B": B, "B_pad": B_pad, "BB": BB, "T": T, "E": E,
    }


def attention_layer(inp, hidden, enc_prep, prep):
    """Pallas forward mirroring AttentionLayer.forward (bias-free Linears)."""
    if isinstance(hidden, tuple):           # mirror the PyTorch LSTM-state case
        hidden = hidden[0]
    compute_dtype = prep["W_ae"].dtype
    last_hidden = hidden[-1]                                       # (B, H)
    B, B_pad, BB, T, E = (enc_prep[k] for k in ("B", "B_pad", "BB", "T", "E"))
    D = inp.shape[-1]
    H = prep["W_ah"].shape[1]
    assert H + T <= _LANE, "slab packing assumes H + T <= 128"
    assert enc_prep["enc_flat"].dtype == compute_dtype
    # TODO(synk): for long sequences (large T), tile T with an online-softmax
    # accumulator instead of packing attn_weights into the 128-lane slab.

    # Per-step tensors are tiny (B x H / B x D); padding them each call is cheap.
    hid = last_hidden.astype(compute_dtype)
    x = inp.reshape(B, D).astype(compute_dtype)                    # input.squeeze(1)
    pad = B_pad - B
    if pad:
        hid = jnp.pad(hid, ((0, pad), (0, 0)))
        x = jnp.pad(x, ((0, pad), (0, 0)))

    # Explicit VMEM budget: double-buffered in/out tiles + resident weights +
    # f32 intermediates, with 4x headroom, capped at 32 MiB (safe on v5e/v6e
    # 128 MiB and v7x 64 MiB physical VMEM).
    bpe = jnp.dtype(compute_dtype).itemsize
    per_step = (
        2 * BB * T * E * bpe                       # enc tile
        + 2 * BB * (H + D) * bpe + 2 * BB * T * 4  # hid / inp / mask
        + 2 * BB * _LANE * 4                       # output slab
        + 2 * (2 * E * H + H * H + D * H) * bpe + 2 * H * 4   # weights
        + BB * T * (3 * H + E) * 4                 # f32 intermediates
    )
    vmem_limit = int(min(max(4 * per_step, 8 << 20), 32 << 20))

    grid = (B_pad // BB,)
    const2 = lambda i: (0, 0)       # weights: same block every step (resident)

    slab = pl.pallas_call(
        attn_kernel,
        grid=grid,
        out_shape=jax.ShapeDtypeStruct((B_pad, _LANE), jnp.float32),
        in_specs=[
            pl.BlockSpec((BB * T, E), lambda i: (i, 0)),           # enc (flat)
            pl.BlockSpec((BB, H), lambda i: (i, 0)),               # hidden[-1]
            pl.BlockSpec((BB, T), lambda i: (i, 0)),               # attn_mask
            pl.BlockSpec((BB, D), lambda i: (i, 0)),               # input
            pl.BlockSpec(prep["W_ae"].shape, const2),
            pl.BlockSpec(prep["W_ah"].shape, const2),
            pl.BlockSpec(prep["w_v"].shape, const2),
            pl.BlockSpec(prep["W_comb_inp"].shape, const2),
            pl.BlockSpec(prep["W_comb_app"].shape, const2),
        ],
        out_specs=pl.BlockSpec((BB, _LANE), lambda i: (i, 0)),
        compiler_params=pltpu.CompilerParams(
            dimension_semantics=("parallel",),                     # megacore on v7x
            vmem_limit_bytes=vmem_limit),
    )(enc_prep["enc_flat"], hid, enc_prep["mask"], x,
      prep["W_ae"], prep["W_ah"], prep["w_v"],
      prep["W_comb_inp"], prep["W_comb_app"])

    output = slab[:B, :H].reshape(B, 1, H)
    attn_weights = slab[:B, H:H + T]
    return output, attn_weights


def reference_jax(inp, hidden, enc_states, attn_mask, params):
    """Pure-JAX replica of the PyTorch forward, for validation."""
    last_hidden = hidden[-1]
    B, T, E = enc_states.shape
    hid = jnp.broadcast_to(last_hidden[:, None, :], (B, T, last_hidden.shape[-1]))
    h_merged = jnp.concatenate([enc_states, hid], axis=2)
    active = jnp.tanh(h_merged @ params["attn"].T)
    pre = (active @ params["attn_v"].T)[..., 0]
    pre = jnp.where(attn_mask > 0, pre, -1e20)
    w = jax.nn.softmax(pre, axis=1)
    applied = jnp.einsum("bt,bte->be", w, enc_states)
    merged = jnp.concatenate([inp.reshape(B, -1), applied], axis=1)
    out = jnp.tanh(merged @ params["attn_combine"].T)[:, None, :]
    return out, w


def _run_case(key, B, T, D, H, params, prep, rtol=2e-2, atol=2e-2):
    E = 2 * D
    k = jax.random.split(key, 4)
    inp = jax.random.normal(k[0], (B, 1, D), jnp.float32)
    hidden = jax.random.normal(k[1], (1, B, H), jnp.float32)       # (num_layers, B, H)
    enc_states = jax.random.normal(k[2], (B, T, E), jnp.float32)
    mask = (jax.random.uniform(k[3], (B, T)) > 0.3).astype(jnp.int32)
    mask = mask.at[:, 0].set(1)                                    # keep >= 1 position

    # Once per sequence; reused across decode steps.
    enc_prep = prepare_encoder_states(enc_states, mask)

    out, attw = attention_layer(inp, hidden, enc_prep, prep)
    out = jax.block_until_ready(out)
    attw = jax.block_until_ready(attw)

    ref_out, ref_attw = reference_jax(inp, hidden, enc_states, mask, params)
    assert out.shape == (B, 1, H) and attw.shape == (B, T)
    # bf16 MXU operands with f32 accumulation -> ~1e-2-level diffs vs f32 ref.
    assert jnp.allclose(out, ref_out, atol=atol, rtol=rtol), \
        float(jnp.max(jnp.abs(out - ref_out)))
    assert jnp.allclose(attw, ref_attw, atol=atol, rtol=rtol), \
        float(jnp.max(jnp.abs(attw - ref_attw)))


if __name__ == "__main__":
    # Sizes implied by the module: input_dim=D, hidden_size=H, bidirectional -> E = 2*D
    T, D, H = 8, 16, 32
    E = 2 * D  # hXdirs

    key = jax.random.PRNGKey(0)
    kp, k1, k2 = jax.random.split(key, 3)
    kw = jax.random.split(kp, 3)

    def linear_init(key, out_f, in_f):
        bound = 1.0 / jnp.sqrt(in_f)
        return jax.random.uniform(key, (out_f, in_f), jnp.float32, -bound, bound)

    params = {
        "attn_combine": linear_init(kw[0], H, E + D),  # Linear(hXdirs + input_dim, H)
        "attn":         linear_init(kw[1], H, H + E),  # Linear(H + hXdirs, H)
        "attn_v":       linear_init(kw[2], 1, H),      # Linear(H, 1)
    }
    prep = prepare_attention_params(params, input_dim=D, hXdirs=E)  # once, at load time

    # Small batch (single grid step) and a larger batch exercising padding +
    # the multi-step "parallel" grid (2 steps -> both v7x TensorCores).
    _run_case(k1, B=2, T=T, D=D, H=H, params=params, prep=prep)
    _run_case(k2, B=20, T=T, D=D, H=H, params=params, prep=prep)

    print("KERNEL_OK")
</pallas_src>

<mosaic_0001>
module attributes {stable_mosaic.version = 11 : i64} {
  func.func @attn_kernel(%arg0: i32, %arg1: memref<64x32xbf16, #tpu.memory_space<vmem>>, %arg2: memref<8x32xbf16, #tpu.memory_space<vmem>>, %arg3: memref<8x8xi32, #tpu.memory_space<vmem>>, %arg4: memref<8x16xbf16, #tpu.memory_space<vmem>>, %arg5: memref<32x32xbf16, #tpu.memory_space<vmem>>, %arg6: memref<32x32xbf16, #tpu.memory_space<vmem>>, %arg7: memref<1x32xf32, #tpu.memory_space<vmem>>, %arg8: memref<16x32xbf16, #tpu.memory_space<vmem>>, %arg9: memref<32x32xbf16, #tpu.memory_space<vmem>>, %arg10: memref<8x128xf32, #tpu.memory_space<vmem>>) attributes {dimension_semantics = [#tpu.dimension_semantics<parallel>], iteration_bounds = array<i64: 1>, scalar_prefetch = 0 : i64, scratch_operands = 0 : i64, tpu.core_type = #tpu.core_type<tc>, window_params = [{transform_indices = @transform_0, window_bounds = array<i64: 64, 32>}, {transform_indices = @transform_1, window_bounds = array<i64: 8, 32>}, {transform_indices = @transform_2, window_bounds = array<i64: 8, 8>}, {transform_indices = @transform_3, window_bounds = array<i64: 8, 16>}, {pipeline_mode = #tpu.pipeline_mode<synchronous>, transform_indices = @transform_4, window_bounds = array<i64: 32, 32>}, {pipeline_mode = #tpu.pipeline_mode<synchronous>, transform_indices = @transform_5, window_bounds = array<i64: 32, 32>}, {pipeline_mode = #tpu.pipeline_mode<synchronous>, transform_indices = @transform_6, window_bounds = array<i64: 1, 32>}, {pipeline_mode = #tpu.pipeline_mode<synchronous>, transform_indices = @transform_7, window_bounds = array<i64: 16, 32>}, {pipeline_mode = #tpu.pipeline_mode<synchronous>, transform_indices = @transform_8, window_bounds = array<i64: 32, 32>}, {transform_indices = @transform_9, window_bounds = array<i64: 8, 128>}]} {
    %c0 = arith.constant 0 : index
    %c0_0 = arith.constant 0 : index
    %0 = vector.load %arg1[%c0, %c0_0] : memref<64x32xbf16, #tpu.memory_space<vmem>>, vector<64x32xbf16>
    %c0_1 = arith.constant 0 : index
    %c0_2 = arith.constant 0 : index
    %1 = vector.load %arg5[%c0_1, %c0_2] : memref<32x32xbf16, #tpu.memory_space<vmem>>, vector<32x32xbf16>
    %cst = arith.constant dense<0.000000e+00> : vector<64x32xf32>
    %2 = tpu.matmul %0, %1, %cst {dimension_numbers = #tpu.dot_dimension_numbers<[1], [0], [0], [1], [0, 0, 1, 1], [], []>} : vector<64x32xbf16>, vector<32x32xbf16>, vector<64x32xf32> -> vector<64x32xf32>
    %c0_3 = arith.constant 0 : index
    %c0_4 = arith.constant 0 : index
    %3 = vector.load %arg2[%c0_3, %c0_4] : memref<8x32xbf16, #tpu.memory_space<vmem>>, vector<8x32xbf16>
    %c0_5 = arith.constant 0 : index
    %c0_6 = arith.constant 0 : index
    %4 = vector.load %arg6[%c0_5, %c0_6] : memref<32x32xbf16, #tpu.memory_space<vmem>>, vector<32x32xbf16>
    %cst_7 = arith.constant dense<0.000000e+00> : vector<8x32xf32>
    %5 = tpu.matmul %3, %4, %cst_7 {dimension_numbers = #tpu.dot_dimension_numbers<[1], [0], [0], [1], [0, 0, 1, 1], [], []>} : vector<8x32xbf16>, vector<32x32xbf16>, vector<8x32xf32> -> vector<8x32xf32>
    %6 = vector.shape_cast %2 : vector<64x32xf32> to vector<8x8x32xf32>
    %7 = vector.shape_cast %5 : vector<8x32xf32> to vector<8x1x32xf32>
    %8 = vector.broadcast %7 : vector<8x1x32xf32> to vector<8x8x32xf32>
    %9 = arith.addf %6, %8 : vector<8x8x32xf32>
    %10 = math.tanh %9 : vector<8x8x32xf32>
    %c0_8 = arith.constant 0 : index
    %c0_9 = arith.constant 0 : index
    %11 = vector.load %arg7[%c0_8, %c0_9] : memref<1x32xf32, #tpu.memory_space<vmem>>, vector<1x32xf32>
    %12 = vector.shape_cast %11 : vector<1x32xf32> to vector<1x1x32xf32>
    %13 = vector.broadcast %12 : vector<1x1x32xf32> to vector<8x8x32xf32>
    %14 = arith.mulf %10, %13 : vector<8x8x32xf32>
    %cst_10 = arith.constant dense<0.000000e+00> : vector<8x8xf32>
    %15 = vector.multi_reduction <add>, %14, %cst_10 [2] : vector<8x8x32xf32> to vector<8x8xf32>
    %c0_11 = arith.constant 0 : index
    %c0_12 = arith.constant 0 : index
    %16 = vector.load %arg3[%c0_11, %c0_12] : memref<8x8xi32, #tpu.memory_space<vmem>>, vector<8x8xi32>
    %c0_i32 = arith.constant 0 : i32
    %17 = vector.broadcast %c0_i32 : i32 to vector<8x8xi32>
    %18 = arith.cmpi sgt, %16, %17 : vector<8x8xi32>
    %cst_13 = arith.constant -1.000000e+20 : f32
    %19 = vector.broadcast %cst_13 : f32 to vector<8x8xf32>
    %20 = arith.select %18, %15, %19 : vector<8x8xi1>, vector<8x8xf32>
    %cst_14 = arith.constant dense<0xFF800000> : vector<8xf32>
    %21 = vector.multi_reduction <maximumf>, %20, %cst_14 [1] : vector<8x8xf32> to vector<8xf32>
    %22 = vector.shape_cast %21 : vector<8xf32> to vector<8x1xf32>
    %23 = vector.broadcast %22 : vector<8x1xf32> to vector<8x8xf32>
    %24 = arith.subf %20, %23 : vector<8x8xf32>
    %25 = math.exp %24 : vector<8x8xf32>
    %cst_15 = arith.constant dense<0.000000e+00> : vector<8xf32>
    %26 = vector.multi_reduction <add>, %25, %cst_15 [1] : vector<8x8xf32> to vector<8xf32>
    %27 = vector.shape_cast %26 : vector<8xf32> to vector<8x1xf32>
    %28 = vector.broadcast %27 : vector<8x1xf32> to vector<8x8xf32>
    %29 = arith.divf %25, %28 : vector<8x8xf32>
    %30 = arith.extf %0 : vector<64x32xbf16> to vector<64x32xf32>
    %31 = vector.shape_cast %30 : vector<64x32xf32> to vector<8x8x32xf32>
    %32 = vector.shape_cast %29 : vector<8x8xf32> to vector<8x8x1xf32>
    %33 = vector.broadcast %32 : vector<8x8x1xf32> to vector<8x8x32xf32>
    %34 = arith.mulf %33, %31 : vector<8x8x32xf32>
    %cst_16 = arith.constant dense<0.000000e+00> : vector<8x32xf32>
    %35 = vector.multi_reduction <add>, %34, %cst_16 [1] : vector<8x8x32xf32> to vector<8x32xf32>
    %c0_17 = arith.constant 0 : index
    %c0_18 = arith.constant 0 : index
    %36 = vector.load %arg4[%c0_17, %c0_18] : memref<8x16xbf16, #tpu.memory_space<vmem>>, vector<8x16xbf16>
    %c0_19 = arith.constant 0 : index
    %c0_20 = arith.constant 0 : index
    %37 = vector.load %arg8[%c0_19, %c0_20] : memref<16x32xbf16, #tpu.memory_space<vmem>>, vector<16x32xbf16>
    %cst_21 = arith.constant dense<0.000000e+00> : vector<8x32xf32>
    %38 = tpu.matmul %36, %37, %cst_21 {dimension_numbers = #tpu.dot_dimension_numbers<[1], [0], [0], [1], [0, 0, 1, 1], [], []>} : vector<8x16xbf16>, vector<16x32xbf16>, vector<8x32xf32> -> vector<8x32xf32>
    %39 = arith.truncf %35 : vector<8x32xf32> to vector<8x32xbf16>
    %c0_22 = arith.constant 0 : index
    %c0_23 = arith.constant 0 : index
    %40 = vector.load %arg9[%c0_22, %c0_23] : memref<32x32xbf16, #tpu.memory_space<vmem>>, vector<32x32xbf16>
    %cst_24 = arith.constant dense<0.000000e+00> : vector<8x32xf32>
    %41 = tpu.matmul %39, %40, %cst_24 {dimension_numbers = #tpu.dot_dimension_numbers<[1], [0], [0], [1], [0, 0, 1, 1], [], []>} : vector<8x32xbf16>, vector<32x32xbf16>, vector<8x32xf32> -> vector<8x32xf32>
    %42 = arith.addf %38, %41 : vector<8x32xf32>
    %43 = math.tanh %42 : vector<8x32xf32>
    %c0_25 = arith.constant 0 : index
    %c0_26 = arith.constant 0 : index
    %44 = vector.load %arg10[%c0_25, %c0_26] : memref<8x128xf32, #tpu.memory_space<vmem>>, vector<8x32xf32>
    tpu.vector_store %arg10[%c0_25, %c0_26], %43 {strides = array<i32>} : memref<8x128xf32, #tpu.memory_space<vmem>>, vector<8x32xf32>,
    %c0_27 = arith.constant 0 : index
    %c32 = arith.constant 32 : index
    %45 = vector.load %arg10[%c0_27, %c32] : memref<8x128xf32, #tpu.memory_space<vmem>>, vector<8x8xf32>
    tpu.vector_store %arg10[%c0_27, %c32], %29 {strides = array<i32>} : memref<8x128xf32, #tpu.memory_space<vmem>>, vector<8x8xf32>,
    return
  }
  func.func @transform_0(%arg0: i32) -> (i32, i32) {
    %c0_i32 = arith.constant 0 : i32
    %c0_i32_0 = arith.constant 0 : i32
    return %arg0, %c0_i32 : i32, i32
  }
  func.func @transform_1(%arg0: i32) -> (i32, i32) {
    %c0_i32 = arith.constant 0 : i32
    %c0_i32_0 = arith.constant 0 : i32
    return %arg0, %c0_i32 : i32, i32
  }
  func.func @transform_2(%arg0: i32) -> (i32, i32) {
    %c0_i32 = arith.constant 0 : i32
    %c0_i32_0 = arith.constant 0 : i32
    return %arg0, %c0_i32 : i32, i32
  }
  func.func @transform_3(%arg0: i32) -> (i32, i32) {
    %c0_i32 = arith.constant 0 : i32
    %c0_i32_0 = arith.constant 0 : i32
    return %arg0, %c0_i32 : i32, i32
  }
  func.func @transform_4(%arg0: i32) -> (i32, i32) {
    %c0_i32 = arith.constant 0 : i32
    %c0_i32_0 = arith.constant 0 : i32
    %c0_i32_1 = arith.constant 0 : i32
    return %c0_i32, %c0_i32_0 : i32, i32
  }
  func.func @transform_5(%arg0: i32) -> (i32, i32) {
    %c0_i32 = arith.constant 0 : i32
    %c0_i32_0 = arith.constant 0 : i32
    %c0_i32_1 = arith.constant 0 : i32
    return %c0_i32, %c0_i32_0 : i32, i32
  }
  func.func @transform_6(%arg0: i32) -> (i32, i32) {
    %c0_i32 = arith.constant 0 : i32
    %c0_i32_0 = arith.constant 0 : i32
    %c0_i32_1 = arith.constant 0 : i32
    return %c0_i32, %c0_i32_0 : i32, i32
  }
  func.func @transform_7(%arg0: i32) -> (i32, i32) {
    %c0_i32 = arith.constant 0 : i32
    %c0_i32_0 = arith.constant 0 : i32
    %c0_i32_1 = arith.constant 0 : i32
    return %c0_i32, %c0_i32_0 : i32, i32
  }
  func.func @transform_8(%arg0: i32) -> (i32, i32) {
    %c0_i32 = arith.constant 0 : i32
    %c0_i32_0 = arith.constant 0 : i32
    %c0_i32_1 = arith.constant 0 : i32
    return %c0_i32, %c0_i32_0 : i32, i32
  }
  func.func @transform_9(%arg0: i32) -> (i32, i32) {
    %c0_i32 = arith.constant 0 : i32
    %c0_i32_0 = arith.constant 0 : i32
    return %arg0, %c0_i32 : i32, i32
  }
}

</mosaic_0001>

<bundles_post_ra>
// kernel: tpu_custom_call.1
= control target key start
LH: loop header
LB: loop body
LE: loop exit
PB: predicated region body
PF: predicated region fallthrough
CT: control target
= control target key end

     0   :  { %14 = vsyncpa [#allocation3], 0  ;;  %s1209_s0 = inlined_call_operand.vmem [shape: bf16[64,32], index: 0, kind: input, shape index: {}]   ;;  %s1210_s1 = inlined_call_operand.hbm [shape: bf16[8,32], index: 1, kind: input, shape index: {}]   ;;  %s1211_s2 = inlined_call_operand.hbm [shape: s32[8,8], index: 2, kind: input, shape index: {}]   ;;  %s1212_s3 = inlined_call_operand.hbm [shape: bf16[8,16], index: 3, kind: input, shape index: {}]   ;;  %s1213_s4 = inlined_call_operand.vmem [shape: bf16[32,32], index: 4, kind: input, shape index: {}]   ;;  %s1214_s5 = inlined_call_operand.vmem [shape: bf16[32,32], index: 5, kind: input, shape index: {}]   ;;  %s1215_s6 = inlined_call_operand.vmem [shape: f32[1,32], index: 6, kind: input, shape index: {}]   ;;  %s1216_s7 = inlined_call_operand.vmem [shape: bf16[16,32], index: 7, kind: input, shape index: {}]   ;;  %s1217_s8 = inlined_call_operand.vmem [shape: bf16[32,32], index: 8, kind: input, shape index: {}]   ;;  %s1218_s9 = inlined_call_operand.hbm [shape: f32[8,128], index: 9, kind: output, shape index: {}]  }
   0x1   :  { %15 = vsyncpa [#allocation6], 0 }
   0x2   :  { %16 = vsyncpa [#allocation4], 0  ;;  %s974_s30 = smov [#allocation5]   ;;  %s975_s11 = smov [#allocation2]  }
   0x3   :  { %s35_s10 = sshll.u32 %s974_s30, 4  ;;  %s25_s12 = sshll.u32 %s975_s11, 4  ;;  %s36_s10 = int_to_ptr.vmem [resolvable:$true] %s35_s10  ;;  %s26_s12 = int_to_ptr.vmem [resolvable:$true] %s25_s12 }
   0x4   :  { %s880_s15 = scalar_lea.hbm %s1211_s2, 128 }
   0x5   :  { %p881_p0 = scmp.ne.s32.totalorder %s1211_s2, %s880_s15  ;;  %p884_p1 = scmp.lt.u32.totalorder %s880_s15, %s1211_s2 }
   0x7   :  { %p886_p2 = pnand %p884_p1, %p881_p0 }
   0x9   :  { %889 = shalt.err (!%p886_p2)
}
   0xa   :  { %s890_s20 = scalar_lea.vmem %s36_s10, 128  ;;  %p895_p4 = scmp.lt.s32.totalorder %s36_s10, %s36_s10 }
   0xb   :  { %p891_p3 = scmp.ne.s32.totalorder %s36_s10, %s890_s20  ;;  %p896_p5 = scmp.lt.s32.totalorder %s890_s20, %s890_s20 }
   0xd   :  { %p897_p6 = por %p896_p5, %p895_p4 }
   0xf   :  { %p898_p7 = pnand %p897_p6, %p891_p3 }
  0x11   :  { %901 = shalt.err (!%p898_p7)
}
  0x12   :  { %38 = dma.hbm_to_vmem [thread:$0]  %s1211_s2, 128, %s36_s10, [#allocation6]  }
  0x13   :  { %s902_s25 = scalar_lea.hbm %s1210_s1, 64 }
  0x14   :  { %p903_p8 = scmp.ne.s32.totalorder %s1210_s1, %s902_s25  ;;  %p906_p9 = scmp.lt.u32.totalorder %s902_s25, %s1210_s1 }
  0x16   :  { %p908_p10 = pnand %p906_p9, %p903_p8 }
  0x18   :  { %911 = shalt.err (!%p908_p10)
}
  0x19   :  { %s912_s30 = scalar_lea.vmem %s26_s12, 64  ;;  %p917_p12 = scmp.lt.s32.totalorder %s26_s12, %s26_s12 }
  0x1a   :  { %p913_p11 = scmp.ne.s32.totalorder %s26_s12, %s912_s30  ;;  %p918_p13 = scmp.lt.s32.totalorder %s912_s30, %s912_s30 }
  0x1c   :  { %p919_p0 = por %p918_p13, %p917_p12 }
  0x1e   :  { %p920_p1 = pnand %p919_p0, %p913_p11 }
  0x20   :  { %923 = shalt.err (!%p920_p1)
}
  0x21   :  { %28 = dma.hbm_to_vmem [thread:$0]  %s1210_s1, 64, %s26_s12, [#allocation3]  }
  0x22   :  { %s976_s11 = smov [#allocation7]   ;;  %s924_s16 = scalar_lea.hbm %s1212_s3, 64 }
  0x23   :  { %s45_s13 = sshll.u32 %s976_s11, 4  ;;  %p925_p2 = scmp.ne.s32.totalorder %s1212_s3, %s924_s16  ;;  %s46_s13 = int_to_ptr.vmem [resolvable:$true] %s45_s13 }
  0x24   :  { %p928_p3 = scmp.lt.u32.totalorder %s924_s16, %s1212_s3 }
  0x26   :  { %p930_p4 = pnand %p928_p3, %p925_p2 }
  0x28   :  { %933 = shalt.err (!%p930_p4)
}
  0x29   :  { %s934_s21 = scalar_lea.vmem %s46_s13, 64  ;;  %p939_p6 = scmp.lt.s32.totalorder %s46_s13, %s46_s13 }
  0x2a   :  { %p935_p5 = scmp.ne.s32.totalorder %s46_s13, %s934_s21  ;;  %p940_p7 = scmp.lt.s32.totalorder %s934_s21, %s934_s21 }
  0x2c   :  { %p941_p8 = por %p940_p7, %p939_p6 }
  0x2e   :  { %p942_p9 = pnand %p941_p8, %p935_p5 }
  0x30   :  { %945 = shalt.err (!%p942_p9)
}
  0x31   :  { %48 = dma.hbm_to_vmem [thread:$0]  %s1212_s3, 64, %s46_s13, [#allocation6]  }
  0x32   :  { %968 = dma.done.wait [#allocation3], 64  }
  0x33   :  { %969 = vsyncadd [#allocation3], 4294967232 }
  0x34   :  { %970 = dma.done.wait [#allocation6], 192  }
  0x35   :  { %971 = vsyncadd [#allocation6], 4294967104  ;;  %v977_v0 = vmov 0.0   ;;  %vm978_vm0 = vmmov 0   ;;  %v843_v1 = vld [vmem:[%s1213_s4] sm:$0xff]   ;;  %v845_v3 = vld [vmem:[%s1213_s4 + $0x8] sm:$0xff]   ;;  %v256_v12 = vlaneseq }
  0x36   :  { %809 = vmatprep.subr.bf16.mxu1 %v977_v0  ;;  %813 = vmatprep.mubr.msk.bf16.mxu1 %vm978_vm0, %v977_v0  ;;  %v844_v2 = vld [vmem:[%s1214_s5] sm:$0xff]   ;;  %v846_v4 = vld [vmem:[%s1214_s5 + $0x8] sm:$0xff]   ;;  %vm113_vm1 = vcmask 261120   ;;  %v1097_v7 = vld [vmem:[%s1209_s0 + $0x10] sm:$0xff]   ;;  %v979_v10 = vmov 1966171168  }
  0x37   :  { %797 = vmatprep.subr.bf16.mxu0 %v843_v1  ;;  %810 = vmatpush3.bf16.msra.mxu1 %v844_v2  ;;  %v1087_v5 = vld [vmem:[%s1209_s0] sm:$0xff]   ;;  %v1092_v6 = vld [vmem:[%s1209_s0 + $0x8] sm:$0xff]   ;;  %v1110_v9 = vld [vmem:[%s1209_s0 + $0x18] sm:$0xff]   ;;  %v254_v11 = vunpack.c.l.s4 %v979_v10  ;;  %v1117_v14 = vshrl.u32 %v256_v12, 7  ;;  %vm440_vm2 = vcmask 1041409   ;;  %vm442_vm3 = vcmask 1042434  }
  0x38   :  { %798 = vmatpush3.bf16.msra.mxu0 %v843_v1  ;;  %811 = vmatprep.subr.bf16.mxu1 %v977_v0  ;;  %v191_v8 = vld [vmem:[#allocation2] sm:$0xf]  ;;  %vm444_vm4 = vcmask 1043459   ;;  %vm446_vm5 = vcmask 1044484   ;;  %vm448_vm6 = vcmask 1045509   ;;  %vm450_vm7 = vcmask 1046534  }
  0x39   :  { %799 = vmatprep.subr.bf16.mxu0 %v845_v3  ;;  %801 = vmatprep.mubr.msk.bf16.mxu0 %vm113_vm1, %v1087_v5  ;;  %v255_v13 = vunpack.c.0.s8 %v254_v11  ;;  %v1121_v22 = vsub.s32 0, %v1117_v14  ;;  %v777_v58 = vld [vmem:[%s1215_s6] ss:$0 sm:$0xff]  ;;  %vm452_vm8 = vcmask 1047559   ;;  %vm456_vm10 = vcmask 64512   ;;  %s980_s6 = smov 32  }
  0x3a   :  { %vm696_vm11 = vcmask 130048   ;;  %s981_s20 = smov [#allocation8]   ;;  %vm746_vm12 = vcmask 326912  }
  0x3b   :  { %812 = vmatpush3.bf16.msra.mxu1 %v846_v4  ;;  %v258_v15 = vsub.s32 %v255_v13, %v1117_v14  ;;  %s754_s21 = sshll.u32 %s981_s20, 4  ;;  %s755_s21 = int_to_ptr.vmem [resolvable:$true] %s754_s21 }
  0x3c   :  { %800 = vmatpush3.bf16.msra.mxu0 %v845_v3  ;;  %817 = vmatprep.subr.bf16.mxu1 %v977_v0  ;;  %p951_p11 = scmp.lt.s32.totalorder %s755_s21, %s755_s21 }
  0x3e   :  { %814 = vmatmul.mubr.msk.bf16.vlgmr.msra.gmra.mrb[0].mxu1 %vm113_vm1, %v191_v8 }
  0x3f   :  { %802 = vmatmul.mubr.msk.bf16.vlgmr.msra.gmra.mrb[0].mxu0 %vm113_vm1, %v1092_v6  ;;  %821 = vmatprep.mubr.msk.bf16.mxu1 %vm978_vm0, %v977_v0 }
  0x40   :  { %805 = vmatprep.mubr.msk.bf16.mxu0 %vm113_vm1, %v1097_v7 }
  0x47   :  { %806 = vmatmul.mubr.msk.bf16.gmra.mrb[4].mxu0 %vm113_vm1, %v1110_v9 }
 0x111   :  { %v245_v16 = vpop.f32.mrb[0].mxu1 }
 0x112   :  { %v803_v17 = vpop.f32.mrb[0].mxu0  ;;  %v252_v18 = vcombine.high %v245_v16, %v245_v16  ;;  %v259_v19 = vrot.slane %v245_v16, %v258_v15  ;;  %v815_v20 = vpop.f32.mrb[1].mxu1 }
 0x113   :  { %v160_v21 = vpop.f32.mrb[1].mxu0  ;;  %v248_v23 = vpop.f32.mrb[2].mxu1 }
 0x114   :  { %v804_v24 = vpop.f32.mrb[2].mxu0  ;;  %v266_v25 = vrot.slane %v252_v18, %v258_v15  ;;  %v267_v26 = vcombine.high %v259_v19, %v259_v19  ;;  %v275_v27 = vrot.slane %v259_v19, %v258_v15  ;;  %v816_v28 = vpop.f32.mrb[3].mxu1 }
 0x115   :  { %v163_v29 = vpop.f32.mrb[3].mxu0 }
 0x116   :  { %v268_v30 = vcombine.high %v266_v25, %v266_v25  ;;  %v282_v31 = vrot.slane %v266_v25, %v258_v15  ;;  %v289_v32 = vrot.slane %v267_v26, %v258_v15  ;;  %v297_v33 = vcombine.high %v275_v27, %v275_v27 }
 0x117   :  { %v304_v34 = vrot.slane %v275_v27, %v1121_v22  ;;  %v407_v27 = vand.u32 127, %v256_v12 }
 0x118   :  { %v312_v35 = vrot.slane %v297_v33, %v1121_v22  ;;  %v299_v36 = vcombine.high %v289_v32, %v289_v32  ;;  %v308_v37 = vrot.slane %v289_v32, %v1121_v22  ;;  %v298_v38 = vcombine.high %v282_v31, %v282_v31 }
 0x119   :  { %v341_v39 = vadd.f32 %v304_v34, %v160_v21  ;;  %v320_v41 = vrot.slane %v282_v31, %v1121_v22  ;;  %v296_v42 = vrot.slane %v268_v30, %v258_v15 }
 0x11a   :  { %v807_v40 = vpop.f32.mrb[4].mxu0  ;;  %v343_v43 = vadd.f32 %v803_v17, %v312_v35  ;;  %v316_v44 = vrot.slane %v299_v36, %v1121_v22  ;;  %v342_v45 = vadd.f32 %v308_v37, %v163_v29  ;;  %v328_v46 = vrot.slane %v298_v38, %v1121_v22 }
 0x11b   :  { %v176_v47 = vpop.f32.mrb[5].mxu0  ;;  %858 = vtanh.f32 %v341_v39  ;;  %v300_v50 = vcombine.high %v296_v42, %v296_v42  ;;  %v324_v51 = vrot.slane %v296_v42, %v1121_v22  ;;  %v410_v29 = vsub.s32 %v407_v27, %v1117_v14 }
 0x11c   :  { %v345_v48 = vadd.f32 %v320_v41, %v176_v47  ;;  %v808_v49 = vpop.f32.mrb[6].mxu0  ;;  %860 = vtanh.f32 %v343_v43  ;;  %v344_v52 = vadd.f32 %v804_v24, %v316_v44  ;;  %v347_v53 = vadd.f32 %v807_v40, %v328_v46  ;;  %v396_v44 = vld [vmem:[#allocation5] sm:$0xff] }
 0x11d   :  { %v179_v54 = vpop.f32.mrb[7].mxu0  ;;  %862 = vtanh.f32 %v342_v45  ;;  %v332_v55 = vrot.slane %v300_v50, %v1121_v22  ;;  %vm397_vm9 = vcmp.gt.s32.totalorder %v396_v44, 0  ;;  %v470_v27 = vunpack.c.l.bf16 %v1092_v6 }
 0x11e   :  { %v346_v56 = vadd.f32 %v324_v51, %v179_v54  ;;  %864 = vtanh.f32 %v344_v52 }
 0x11f   :  { %v348_v57 = vadd.f32 %v808_v49, %v332_v55  ;;  %866 = vtanh.f32 %v345_v48 }
 0x120   :  { %868 = vtanh.f32 %v346_v56 }
 0x121   :  { %870 = vtanh.f32 %v347_v53 }
 0x122   :  { %872 = vtanh.f32 %v348_v57 }
 0x125   :  { %v859_v59 = vpop.eup %858 }
 0x126   :  { %v861_v60 = vpop.eup %860  ;;  %v364_v61 = vmul.f32 %v859_v59, %v777_v58 }
 0x127   :  { %v863_v62 = vpop.eup %862  ;;  %v366_v63 = vmul.f32 %v861_v60, %v777_v58  ;;  %v485_v60 = vsub.s32 1, %v1117_v14 }
 0x128   :  { %v865_v1 = vpop.eup %864  ;;  %v372_v2 = vsel %vm113_vm1, %v364_v61, 0.0  ;;  %v365_v3 = vmul.f32 %v863_v62, %v777_v58 }
 0x129   :  { %373 = vadd.xlane.f32.xlu0 %v372_v2  ;;  %v378_v4 = vsel %vm113_vm1, %v366_v63, 0.0  ;;  %v367_v8 = vmul.f32 %v865_v1, %v777_v58  ;;  %v867_v10 = vpop.eup %866  ;;  %v492_v2 = vsub.s32 2, %v1117_v14 }
 0x12a   :  { %379 = vadd.xlane.f32.xlu1 %v378_v4  ;;  %v869_v11 = vpop.eup %868  ;;  %v375_v13 = vsel %vm113_vm1, %v365_v3, 0.0  ;;  %v368_v15 = vmul.f32 %v867_v10, %v777_v58  ;;  %v506_v3 = vsub.s32 4, %v1117_v14  ;;  %v499_v10 = vsub.s32 3, %v1117_v14 }
 0x12b   :  { %v871_v16 = vpop.eup %870  ;;  %v381_v17 = vsel %vm113_vm1, %v367_v8, 0.0  ;;  %v369_v18 = vmul.f32 %v869_v11, %v777_v58  ;;  %v520_v11 = vsub.s32 6, %v1117_v14 }
 0x12c   :  { %v873_v19 = vpop.eup %872  ;;  %v384_v20 = vsel %vm113_vm1, %v368_v15, 0.0  ;;  %v370_v21 = vmul.f32 %v871_v16, %v777_v58  ;;  %v513_v16 = vsub.s32 5, %v1117_v14 }
 0x12d   :  { %376 = vadd.xlane.f32.xlu0 %v375_v13  ;;  %v387_v23 = vsel %vm113_vm1, %v369_v18, 0.0  ;;  %v371_v24 = vmul.f32 %v873_v19, %v777_v58  ;;  %v851_v19 = vld [vmem:[%s1217_s8] sm:$0xff]  }
 0x12e   :  { %382 = vadd.xlane.f32.xlu1 %v381_v17  ;;  %v390_v25 = vsel %vm113_vm1, %v370_v21, 0.0  ;;  %v527_v17 = vsub.s32 7, %v1117_v14  ;;  %818 = vmatpush3.bf16.msra.mxu1 %v851_v19  ;;  %v469_v14 = vunpack.c.h.bf16 %v1087_v5  ;;  %v468_v21 = vunpack.c.l.bf16 %v1087_v5 }
 0x12f   :  { %v393_v26 = vsel %vm113_vm1, %v371_v24, 0.0  ;;  %819 = vmatprep.subr.bf16.mxu1 %v977_v0  ;;  %v471_v5 = vunpack.c.h.bf16 %v1092_v6 }
 0x131   :  { %385 = vadd.xlane.f32.xlu0 %v384_v20  ;;  %v852_v20 = vld [vmem:[%s1217_s8 + $0x8] sm:$0xff]  }
 0x132   :  { %388 = vadd.xlane.f32.xlu1 %v387_v23  ;;  %820 = vmatpush3.bf16.msra.mxu1 %v852_v20 }
 0x133   :  { %825 = vmatprep.subr.bf16.mxu1 %v977_v0 }
 0x135   :  { %391 = vadd.xlane.f32.xlu0 %v390_v25 }
 0x136   :  { %394 = vadd.xlane.f32.xlu1 %v393_v26 }
 0x1b6   :  { %v374_v28 = vpop.xlane.xlu0 %373 }
 0x1b7   :  { %v380_v30 = vpop.xlane.xlu1 %379  ;;  %v411_v32 = vrot.slane %v374_v28, %v410_v29  ;;  %v472_v28 = vunpack.c.l.bf16 %v1097_v7 }
 0x1b8   :  { %v419_v35 = vrot.slane %v380_v30, %v410_v29 }
 0x1ba   :  { %v377_v31 = vpop.xlane.xlu0 %376 }
 0x1bb   :  { %v415_v33 = vrot.slane %v377_v31, %v410_v29  ;;  %v383_v34 = vpop.xlane.xlu1 %382 }
 0x1bc   :  { %v423_v36 = vrot.slane %v383_v34, %v410_v29 }
 0x1bd   :  { %v441_v37 = vsel %vm440_vm2, %v415_v33, %v411_v32 }
 0x1be   :  { %v443_v38 = vsel %vm442_vm3, %v419_v35, %v441_v37  ;;  %v386_v39 = vpop.xlane.xlu0 %385  ;;  %v474_v37 = vunpack.c.l.bf16 %v1110_v9 }
 0x1bf   :  { %v445_v12 = vsel %vm444_vm4, %v423_v36, %v443_v38  ;;  %v427_v40 = vrot.slane %v386_v39, %v410_v29  ;;  %v389_v41 = vpop.xlane.xlu1 %388 }
 0x1c0   :  { %v431_v42 = vrot.slane %v389_v41, %v410_v29 }
 0x1c1   :  { %v447_v43 = vsel %vm446_vm5, %v427_v40, %v445_v12 }
 0x1c2   :  { %v449_v45 = vsel %vm448_vm6, %v431_v42, %v447_v43  ;;  %v392_v46 = vpop.xlane.xlu0 %391 }
 0x1c3   :  { %v435_v47 = vrot.slane %v392_v46, %v410_v29  ;;  %v395_v48 = vpop.xlane.xlu1 %394 }
 0x1c4   :  { %v439_v49 = vrot.slane %v395_v48, %v410_v29 }
 0x1c5   :  { %v451_v50 = vsel %vm450_vm7, %v435_v47, %v449_v45 }
 0x1c6   :  { %v453_v51 = vsel %vm452_vm8, %v439_v49, %v451_v50  ;;  %v473_v49 = vunpack.c.h.bf16 %v1097_v7 }
 0x1c7   :  { %v455_v52 = vsel %vm397_vm9, %v453_v51, -1e+20 }
 0x1c8   :  { %v457_v53 = vsel %vm456_vm10, %v455_v52, -inf }
 0x1c9   :  { %458 = vmax.xlane.f32.xlu0 %v457_v53 }
 0x256   :  { %v459_v54 = vpop.xlane.xlu0 %458 }
 0x257   :  { %v460_v55 = vsub.f32 %v455_v52, %v459_v54 }
 0x259   :  { %v461_v56 = vmul.f32 1.442695, %v460_v55 }
 0x25b   :  { %874 = vpow2.f32 %v461_v56 }
 0x265   :  { %v875_v57 = vpop.eup %874 }
 0x266   :  { %v463_v58 = vsel %vm456_vm10, %v875_v57, 0.0 }
 0x267   :  { %464 = vadd.xlane.f32.xlu1 %v463_v58 }
 0x2f4   :  { %v465_v59 = vpop.xlane.xlu1 %464 }
 0x2f5   :  { %876 = vrcp.f32 %v465_v59 }
 0x2ff   :  { %v877_v61 = vpop.eup %876 }
 0x300   :  { %v467_v62 = vmul.f32 %v877_v61, %v875_v57 }
 0x302   :  { %v486_v63 = vrot.slane %v467_v62, %v485_v60  ;;  %v479_v1 = vrot.slane %v467_v62, %v1121_v22  ;;  %v493_v4 = vrot.slane %v467_v62, %v492_v2  ;;  %v507_v8 = vrot.slane %v467_v62, %v506_v3 }
 0x303   :  { %v500_v13 = vrot.slane %v467_v62, %v499_v10  ;;  %v521_v15 = vrot.slane %v467_v62, %v520_v11  ;;  %v514_v22 = vrot.slane %v467_v62, %v513_v16  ;;  %v528_v18 = vrot.slane %v467_v62, %v527_v17 }
 0x304   :  { %488 = vbcast.lane.b32.xlu1 %v486_v63, 256  ;;  %481 = vbcast.lane.b32.xlu0 %v479_v1, 256  ;;  %v475_v63 = vunpack.c.h.bf16 %v1110_v9 }
 0x308   :  { %495 = vbcast.lane.b32.xlu1 %v493_v4, 256  ;;  %509 = vbcast.lane.b32.xlu0 %v507_v8, 256 }
 0x30c   :  { %502 = vbcast.lane.b32.xlu1 %v500_v13, 256  ;;  %523 = vbcast.lane.b32.xlu0 %v521_v15, 256 }
 0x310   :  { %516 = vbcast.lane.b32.xlu1 %v514_v22, 256  ;;  %743 = vrot.lane.b32.xlu0 %v467_v62, %s980_s6 }
 0x314   :  { %530 = vbcast.lane.b32.xlu1 %v528_v18, 256 }
 0x376   :  { %v489_v23 = vpop.permute.xlu1 %488  ;;  %v482_v24 = vpop.permute.xlu0 %481 }
 0x377   :  { %v533_v25 = vmul.f32 %v489_v23, %v469_v14  ;;  %v532_v26 = vmul.f32 %v482_v24, %v468_v21 }
 0x379   :  { %v547_v29 = vsel %vm113_vm1, %v533_v25, 0.0  ;;  %v540_v30 = vsel %vm113_vm1, %v532_v26, 0.0 }
 0x37a   :  { %v548_v31 = vrot.slane %v547_v29, 4  ;;  %v541_v32 = vrot.slane %v540_v30, 4  ;;  %v496_v33 = vpop.permute.xlu1 %495  ;;  %v510_v34 = vpop.permute.xlu0 %509 }
 0x37b   :  { %v534_v35 = vmul.f32 %v496_v33, %v470_v27  ;;  %v536_v36 = vmul.f32 %v510_v34, %v472_v28 }
 0x37c   :  { %v549_v38 = vadd.f32 %v548_v31, %v547_v29  ;;  %v542_v39 = vadd.f32 %v541_v32, %v540_v30 }
 0x37d   :  { %v554_v12 = vsel %vm113_vm1, %v534_v35, 0.0  ;;  %v568_v40 = vsel %vm113_vm1, %v536_v36, 0.0 }
 0x37e   :  { %v550_v41 = vrot.slane %v549_v38, 2  ;;  %v543_v42 = vrot.slane %v542_v39, 2  ;;  %v555_v43 = vrot.slane %v554_v12, 4  ;;  %v569_v44 = vrot.slane %v568_v40, 4  ;;  %v503_v45 = vpop.permute.xlu1 %502  ;;  %v524_v46 = vpop.permute.xlu0 %523 }
 0x37f   :  { %v535_v47 = vmul.f32 %v503_v45, %v471_v5  ;;  %v538_v48 = vmul.f32 %v524_v46, %v474_v37 }
 0x380   :  { %v551_v50 = vadd.f32 %v550_v41, %v549_v38  ;;  %v544_v6 = vadd.f32 %v543_v42, %v542_v39  ;;  %v556_v51 = vadd.f32 %v555_v43, %v554_v12  ;;  %v570_v52 = vadd.f32 %v569_v44, %v568_v40 }
 0x381   :  { %v561_v53 = vsel %vm113_vm1, %v535_v47, 0.0  ;;  %v582_v54 = vsel %vm113_vm1, %v538_v48, 0.0 }
 0x382   :  { %v552_v55 = vrot.slane %v551_v50, 1  ;;  %v545_v56 = vrot.slane %v544_v6, 1  ;;  %v557_v57 = vrot.slane %v556_v51, 2  ;;  %v571_v58 = vrot.slane %v570_v52, 2  ;;  %v517_v59 = vpop.permute.xlu1 %516 }
 0x383   :  { %v562_v60 = vrot.slane %v561_v53, 4  ;;  %v583_v61 = vrot.slane %v582_v54, 4  ;;  %v537_v62 = vmul.f32 %v517_v59, %v473_v49 }
 0x384   :  { %v553_v1 = vadd.f32 %v552_v55, %v551_v50  ;;  %v546_v7 = vadd.f32 %v545_v56, %v544_v6  ;;  %v558_v2 = vadd.f32 %v557_v57, %v556_v51  ;;  %v572_v3 = vadd.f32 %v571_v58, %v570_v52  ;;  %v853_v58 = vld [vmem:[%s1216_s7] sm:$0xff]   ;;  %s946_s7 = scalar_lea.vmem %s755_s21, 128 }
 0x385   :  { %v563_v4 = vadd.f32 %v562_v60, %v561_v53  ;;  %v584_v8 = vadd.f32 %v583_v61, %v582_v54  ;;  %v575_v10 = vsel %vm113_vm1, %v537_v62, 0.0  ;;  %v596_v60 = vld [vmem:[#allocation7] sm:$0xf]  ;;  %p947_p10 = scmp.ne.s32.totalorder %s755_s21, %s946_s7  ;;  %p952_p12 = scmp.lt.s32.totalorder %s946_s7, %s946_s7 }
 0x386   :  { %v559_v11 = vrot.slane %v558_v2, 1  ;;  %v531_v13 = vpop.permute.xlu1 %530  ;;  %v576_v22 = vrot.slane %v575_v10, 4  ;;  %v600_v18 = vpack.c.bf16 %v553_v1, %v553_v1  ;;  %v599_v19 = vpack.c.bf16 %v546_v7, %v546_v7 }
 0x387   :  { %v564_v15 = vrot.slane %v563_v4, 2  ;;  %v585_v16 = vrot.slane %v584_v8, 2  ;;  %v539_v17 = vmul.f32 %v531_v13, %v475_v63  ;;  %v573_v14 = vrot.slane %v572_v3, 1  ;;  %p953_p13 = por %p952_p12, %p951_p11 }
 0x388   :  { %v560_v20 = vadd.f32 %v559_v11, %v558_v2  ;;  %v577_v23 = vadd.f32 %v576_v22, %v575_v10  ;;  %v620_v32 = vunpack.c.l.b16 %v600_v18  ;;  %v619_v33 = vunpack.c.l.b16 %v599_v19  ;;  %v744_v2 = vpop.permute.xlu0 %743 }
 0x389   :  { %v565_v21 = vadd.f32 %v564_v15, %v563_v4  ;;  %v586_v9 = vadd.f32 %v585_v16, %v584_v8  ;;  %v589_v24 = vsel %vm113_vm1, %v539_v17, 0.0  ;;  %v574_v30 = vadd.f32 %v573_v14, %v572_v3  ;;  %p954_p0 = pnand %p953_p13, %p947_p10 }
 0x38a   :  { %v601_v25 = vpack.c.bf16 %v560_v20, %v560_v20  ;;  %v590_v26 = vrot.slane %v589_v24, 4  ;;  %v578_v29 = vrot.slane %v577_v23, 2  ;;  %v627_v41 = vsel %vm440_vm2, %v620_v32, %v619_v33 }
 0x38b   :  { %v566_v27 = vrot.slane %v565_v21, 1  ;;  %v587_v28 = vrot.slane %v586_v9, 1  ;;  %v603_v12 = vpack.c.bf16 %v574_v30, %v574_v30 }
 0x38c   :  { %v591_v31 = vadd.f32 %v590_v26, %v589_v24  ;;  %v579_v35 = vadd.f32 %v578_v29, %v577_v23  ;;  %v621_v36 = vunpack.c.l.b16 %v601_v25 }
 0x38d   :  { %v567_v34 = vadd.f32 %v566_v27, %v565_v21  ;;  %v588_v38 = vadd.f32 %v587_v28, %v586_v9  ;;  %v623_v49 = vunpack.c.l.b16 %v603_v12 }
 0x38e   :  { %v592_v5 = vrot.slane %v591_v31, 2  ;;  %v580_v39 = vrot.slane %v579_v35, 1  ;;  %v628_v44 = vsel %vm442_vm3, %v621_v36, %v627_v41 }
 0x38f   :  { %v602_v37 = vpack.c.bf16 %v567_v34, %v567_v34  ;;  %v605_v47 = vpack.c.bf16 %v588_v38, %v588_v38 }
 0x390   :  { %v593_v40 = vadd.f32 %v592_v5, %v591_v31  ;;  %v581_v43 = vadd.f32 %v580_v39, %v579_v35 }
 0x391   :  { %v622_v42 = vunpack.c.l.b16 %v602_v37  ;;  %v625_v53 = vunpack.c.l.b16 %v605_v47 }
 0x392   :  { %v594_v45 = vrot.slane %v593_v40, 1  ;;  %v604_v48 = vpack.c.bf16 %v581_v43, %v581_v43 }
 0x393   :  { %v629_v46 = vsel %vm444_vm4, %v622_v42, %v628_v44 }
 0x394   :  { %v595_v50 = vadd.f32 %v594_v45, %v593_v40  ;;  %v624_v6 = vunpack.c.l.b16 %v604_v48  ;;  %v630_v51 = vsel %vm446_vm5, %v623_v49, %v629_v46 }
 0x396   :  { %v606_v52 = vpack.c.bf16 %v595_v50, %v595_v50  ;;  %v631_v54 = vsel %vm448_vm6, %v624_v6, %v630_v51 }
 0x397   :  { %v632_v56 = vsel %vm450_vm7, %v625_v53, %v631_v54 }
 0x398   :  { %v626_v55 = vunpack.c.l.b16 %v606_v52 }
 0x39a   :  { %v633_v57 = vsel %vm452_vm8, %v626_v55, %v632_v56 }
 0x39b   :  { %v634_v59 = vpack.c.b16 %v633_v57, %v633_v57 }
 0x39d   :  { %822 = vmatmul.mubr.msk.bf16.vlgmr.msra.gmra.mrb[4].mxu1 %vm113_vm1, %v634_v59 }
 0x39e   :  { %826 = vmatpush3.bf16.msra.mxu1 %v853_v58  ;;  %827 = vmatprep.mubr.msk.bf16.mxu1 %vm978_vm0, %v977_v0 }
 0x3a9   :  { %828 = vmatmul.mubr.msk.bf16.vlgmr.msra.gmra.mrb[4].mxu1 %vm696_vm11, %v596_v60 }
 0x47c   :  { %v734_v61 = vpop.f32.mrb[4].mxu1 }
 0x47d   :  { %878 = vtanh.f32 %v734_v61  ;;  %v829_v62 = vpop.f32.mrb[5].mxu1 }
 0x47e   :  { %v737_v63 = vpop.f32.mrb[6].mxu1 }
 0x47f   :  { %v830_v1 = vpop.f32.mrb[7].mxu1 }
 0x487   :  { %v879_v7 = vpop.eup %878 }
 0x488   :  { %741 = vst.msk [vmem:[#allocation8] sm:$0xff] %vm113_vm1, %v879_v7 }
 0x489   :  { %747 = vst.msk [vmem:[#allocation8] sm:$0xff] %vm746_vm12, %v744_v2 }
 0x48a   :  { %957 = shalt.err (!%p954_p0)
}
 0x48b   :  { %s958_s22 = scalar_lea.hbm %s1218_s9, 128 }
 0x48c   :  { %p959_p1 = scmp.ne.s32.totalorder %s1218_s9, %s958_s22  ;;  %p962_p2 = scmp.lt.u32.totalorder %s958_s22, %s1218_s9 }
 0x48e   :  { %p964_p3 = pnand %p962_p2, %p959_p1 }
 0x490   :  { %967 = shalt.err (!%p964_p3)
}
 0x491   :  { %757 = dma.vmem_to_hbm [thread:$0]  %s755_s21, 128, %s1218_s9, [#allocation4]  }
 0x492   :  { %972 = dma.done.wait [#allocation4], 128  }
 0x493   :  { %973 = vsyncadd [#allocation4], 4294967168 }
 0x494   :  { %761 = vsyncpa [#allocation3], 1 }
 0x495   :  { %762 = vsyncpa [#allocation6], 1 }
 0x496   :  { %763 = vsyncpa [#allocation4], 1 }

</bundles_post_ra>
